<compile_context>
chip_gen: v7x
topology: tpu7x:2x2x1
jax: 0.10.0
libtpu: 0.0.40
codegen_flags: <defaults>
</compile_context>

<pallas_src>
import functools

import jax
import jax.numpy as jnp
from jax import lax
from jax.experimental import pallas as pl
from jax.experimental.pallas import tpu as pltpu


def _round_up(a, b):
    return (a + b - 1) // b * b


def _make_jaccard_kernel(n_classes, hw_total, needs_mask):
    """Tiled kernel. hw_total = unpadded H*W; needs_mask static (pad exists)."""
    C = n_classes

    def kernel(x_ref, t_ref, inter_ref, union_ref, inter_acc, union_acc):
        p_id = pl.program_id(1)          # HW-parallel split index
        hw_step = pl.program_id(2)       # HW reduction step (last grid axis)
        num_hw = pl.num_programs(2)
        S = x_ref.shape[2]               # rows (of 128 lanes) per block

        @pl.when(hw_step == 0)
        def _():
            inter_acc[...] = jnp.zeros_like(inter_acc)
            union_acc[...] = jnp.zeros_like(union_acc)

        # --- softmax over classes as elementwise ops across C full (S,128) planes ---
        xs = [x_ref[0, c].astype(jnp.float32) for c in range(C)]     # C x (S,128)
        m = xs[0]
        for c in range(1, C):
            m = jnp.maximum(m, xs[c])
        es = [jnp.exp(xc - m) for xc in xs]
        denom = es[0]
        for c in range(1, C):
            denom = denom + es[c]
        # exact reciprocal kept for 1e-5 parity with F.softmax
        rdenom = pl.reciprocal(denom, approx=False)
        ps = [ec * rdenom for ec in es]                              # softmax planes

        # target tile; pad pixels hold class id C, so they never "hit" any class
        t2 = t_ref[0, 0].astype(jnp.int32)                           # (S, 128)

        # --- per-class intersection / union partials (accumulated per lane) ---
        for c in range(C):
            hitc = t2 == c
            # inter   = sum(p * onehot)
            inter_acc[c, :] += jnp.sum(jnp.where(hitc, ps[c], 0.0), axis=0)
            # union   = sum(p + onehot - p*onehot) == sum(where(onehot, 1, p))
            union_acc[c, :] += jnp.sum(jnp.where(hitc, 1.0, ps[c]), axis=0)

        if needs_mask:
            # Only blocks that contain pad pixels need a correction, and only the
            # union does (pad pixels never hit a class, but softmax(0) = 1/C would
            # otherwise leak into the union). Subtract the pad contribution.
            rows_before = (p_id * num_hw + hw_step) * S
            has_pad = (rows_before + S) * 128 > hw_total

            @pl.when(has_pad)
            def _():
                row = lax.broadcasted_iota(jnp.int32, (S, 128), 0)
                lane = lax.broadcasted_iota(jnp.int32, (S, 128), 1)
                invalid = (rows_before + row) * 128 + lane >= hw_total
                for c in range(C):
                    union_acc[c, :] -= jnp.sum(
                        jnp.where(invalid, ps[c], 0.0), axis=0)

        @pl.when(hw_step == num_hw - 1)
        def _():
            # lane-reduce the (C,128) accumulators; outputs are (1,1,C,1) so C stays
            # on the sublane axis and no in-kernel relayout is needed.
            inter_ref[...] = jnp.sum(
                inter_acc[...], axis=1, keepdims=True).reshape(inter_ref.shape)
            union_ref[...] = jnp.sum(
                union_acc[...], axis=1, keepdims=True).reshape(union_ref.shape)

    return kernel


@functools.partial(jax.jit, static_argnames=("n_classes", "block_budget_bytes"))
def jaccard_loss(inputs, target, n_classes, block_budget_bytes=None):
    """inputs: (N, C, H, W) f32/bf16 logits; target: (N, H, W) int class ids.

    Returns scalar  1 - mean_{n,c}( inter / union ), matching the PyTorch module.
    """
    N, C, H, W = inputs.shape
    assert C == n_classes
    HW = H * W

    # keep bf16 logits as bf16 (halves logits HBM read); otherwise f32
    in_dtype = inputs.dtype if inputs.dtype in (jnp.bfloat16, jnp.float32) else jnp.float32
    itemsize = jnp.dtype(in_dtype).itemsize
    # int8 target (fits class ids + the out-of-range pad value) cuts HBM traffic
    t_dtype = jnp.int8 if n_classes < 128 else jnp.int32
    t_itemsize = jnp.dtype(t_dtype).itemsize

    # ---- generation-aware tile / VMEM sizing ----
    try:
        vmem_cap = int(getattr(pltpu.get_tpu_info(), "vmem_capacity_bytes", 64 << 20))
    except Exception:
        vmem_cap = 64 << 20                       # conservative (v7x per-TC)
    if block_budget_bytes is None:
        # double-buffered working set kept well under per-TC VMEM on every gen
        block_budget = min(16 << 20, max((int(vmem_cap * 0.6) // 2) - (1 << 20), 1 << 20))
    else:
        block_budget = int(block_budget_bytes)

    ROW_UNIT = 32                                  # sublane granularity safe for int8 tiles
    bytes_per_row = 128 * (C * itemsize + t_itemsize)
    rows_budget = max(ROW_UNIT, (block_budget // bytes_per_row) // ROW_UNIT * ROW_UNIT)
    rows_raw = (HW + 127) // 128
    S = min(rows_budget, _round_up(rows_raw, ROW_UNIT))   # rows per block

    # v7x megacore: when N is odd (worst case N == 1), also split the HW axis over a
    # second "parallel" grid axis so both TensorCores get work.  No-op on v5e/v6e.
    P = 2 if (N % 2 == 1 and _round_up(rows_raw, S) // S >= 2) else 1

    rows_pad = _round_up(rows_raw, S * P)
    hw_pad = rows_pad * 128
    blocks_per_p = rows_pad // (S * P)
    needs_mask = hw_pad != HW

    x = inputs.reshape(N, C, HW).astype(in_dtype)
    t = target.reshape(N, 1, HW).astype(t_dtype)
    if needs_mask:
        x = jnp.pad(x, ((0, 0), (0, 0), (0, hw_pad - HW)))
        # pad target with an out-of-range class so it never hits a real class
        t = jnp.pad(t, ((0, 0), (0, 0), (0, hw_pad - HW)), constant_values=n_classes)
    x = x.reshape(N, C, rows_pad, 128)
    t = t.reshape(N, 1, rows_pad, 128)

    # exact VMEM working set: double-buffered input blocks + tiny outputs + accumulators
    working = (2 * S * 128 * (C * itemsize + t_itemsize)     # logits + target blocks (x2 buffers)
               + 2 * 2 * max(C, 8) * 128 * 4                 # two (1,1,C,1) output blocks, padded, dbuf
               + 2 * max(C, 8) * 128 * 4)                    # f32 (C,128) accumulators
    vmem_limit = int(min(max(working + (4 << 20), 32 << 20),
                         max(vmem_cap - (8 << 20), 32 << 20)))

    grid_spec = pltpu.PrefetchScalarGridSpec(
        num_scalar_prefetch=0,
        grid=(N, P, blocks_per_p),                           # HW reduction axis last
        in_specs=[
            pl.BlockSpec((1, C, S, 128), lambda n, p, h: (n, 0, p * blocks_per_p + h, 0)),
            pl.BlockSpec((1, 1, S, 128), lambda n, p, h: (n, 0, p * blocks_per_p + h, 0)),
        ],
        out_specs=(
            pl.BlockSpec((1, 1, C, 1), lambda n, p, h: (n, p, 0, 0)),  # resident across HW
            pl.BlockSpec((1, 1, C, 1), lambda n, p, h: (n, p, 0, 0)),
        ),
        scratch_shapes=[
            pltpu.VMEM((C, 128), jnp.float32),   # per-class, per-lane inter accumulator
            pltpu.VMEM((C, 128), jnp.float32),   # per-class, per-lane union accumulator
        ],
    )

    inter, union = pl.pallas_call(
        _make_jaccard_kernel(n_classes, HW, needs_mask),
        out_shape=(
            jax.ShapeDtypeStruct((N, P, C, 1), jnp.float32),
            jax.ShapeDtypeStruct((N, P, C, 1), jnp.float32),
        ),
        grid_spec=grid_spec,
        compiler_params=pltpu.CompilerParams(
            dimension_semantics=("parallel", "parallel", "arbitrary"),
            vmem_limit_bytes=vmem_limit,
        ),
    )(x, t)

    inter = inter.reshape(N, P, C).sum(axis=1)
    union = union.reshape(N, P, C).sum(axis=1)
    # TODO(synk): final scalar reduction (1 - mean) stays in plain JAX glue.
    return 1.0 - jnp.mean(inter / union)


def _reference(inputs, target):
    # pure-JAX reference mirroring the PyTorch forward
    N, C, H, W = inputs.shape
    p = jax.nn.softmax(inputs.astype(jnp.float32), axis=1)
    onehot = jax.nn.one_hot(target, C, axis=1, dtype=jnp.float32)
    prod = p * onehot
    inter = prod.reshape(N, C, -1).sum(axis=2)
    union = (p + onehot - prod).reshape(N, C, -1).sum(axis=2)
    return 1.0 - jnp.mean(inter / union)


if __name__ == "__main__":
    key = jax.random.PRNGKey(0)
    ks = jax.random.split(key, 8)

    # case 1: small spatial size (single padded block, masked union path)
    N, C, H, W = 2, 4, 16, 16
    logits = jax.random.normal(ks[0], (N, C, H, W), dtype=jnp.float32)
    target = jax.random.randint(ks[1], (N, H, W), 0, C, dtype=jnp.int32)
    loss = jax.block_until_ready(jaccard_loss(logits, target, n_classes=C))
    ref = _reference(logits, target)
    assert jnp.allclose(loss, ref, atol=1e-5, rtol=1e-5), (loss, ref)

    # case 2: non-128-multiple spatial size (exercises pad masking)
    H2 = W2 = 13
    logits2 = jax.random.normal(ks[2], (N, C, H2, W2), dtype=jnp.float32)
    target2 = jax.random.randint(ks[3], (N, H2, W2), 0, C, dtype=jnp.int32)
    loss2 = jax.block_until_ready(jaccard_loss(logits2, target2, n_classes=C))
    ref2 = _reference(logits2, target2)
    assert jnp.allclose(loss2, ref2, atol=1e-5, rtol=1e-5), (loss2, ref2)

    # case 3: odd batch (N=1) + small block budget -> exercises the HW-parallel
    # split (both v7x TensorCores), multi-block accumulation and partial-sum epilogue
    N3, C3, H3, W3 = 1, 3, 96, 96
    logits3 = jax.random.normal(ks[4], (N3, C3, H3, W3), dtype=jnp.float32)
    target3 = jax.random.randint(ks[5], (N3, H3, W3), 0, C3, dtype=jnp.int32)
    loss3 = jax.block_until_ready(
        jaccard_loss(logits3, target3, n_classes=C3, block_budget_bytes=64 * 1024))
    ref3 = _reference(logits3, target3)
    assert jnp.allclose(loss3, ref3, atol=1e-5, rtol=1e-5), (loss3, ref3)

    # case 4: exactly-tiled spatial size (mask specialized away) with bf16 logits
    N4, C4, H4, W4 = 2, 4, 64, 64
    logits4 = jax.random.normal(ks[6], (N4, C4, H4, W4), dtype=jnp.float32).astype(jnp.bfloat16)
    target4 = jax.random.randint(ks[7], (N4, H4, W4), 0, C4, dtype=jnp.int32)
    loss4 = jax.block_until_ready(jaccard_loss(logits4, target4, n_classes=C4))
    ref4 = _reference(logits4, target4)
    assert jnp.allclose(loss4, ref4, atol=1e-4, rtol=1e-4), (loss4, ref4)

    print("KERNEL_OK")
</pallas_src>

<mosaic_0001>
module attributes {stable_mosaic.version = 11 : i64} {
  func.func @kernel(%arg0: i32, %arg1: i32, %arg2: i32, %arg3: memref<1x4x32x128xf32, #tpu.memory_space<vmem>>, %arg4: memref<1x1x32x128xi8, #tpu.memory_space<vmem>>, %arg5: memref<1x1x4x1xf32, #tpu.memory_space<vmem>>, %arg6: memref<1x1x4x1xf32, #tpu.memory_space<vmem>>, %arg7: memref<4x128xf32, #tpu.memory_space<vmem>>, %arg8: memref<4x128xf32, #tpu.memory_space<vmem>>) attributes {dimension_semantics = [#tpu.dimension_semantics<parallel>, #tpu.dimension_semantics<parallel>, #tpu.dimension_semantics<arbitrary>], iteration_bounds = array<i64: 2, 1, 1>, scalar_prefetch = 0 : i64, scratch_operands = 2 : i64, tpu.core_type = #tpu.core_type<tc>, window_params = [{transform_indices = @transform_0, window_bounds = array<i64: 1, 4, 32, 128>}, {transform_indices = @transform_1, window_bounds = array<i64: 1, 1, 32, 128>}, {transform_indices = @transform_2, window_bounds = array<i64: 1, 1, 4, 1>}, {transform_indices = @transform_3, window_bounds = array<i64: 1, 1, 4, 1>}]} {
    %c0_i32 = arith.constant 0 : i32
    %0 = arith.cmpi eq, %arg2, %c0_i32 : i32
    %1 = arith.extui %0 : i1 to i32
    %c0_i32_0 = arith.constant 0 : i32
    %2 = arith.cmpi ne, %1, %c0_i32_0 : i32
    scf.if %2 {
      %cst_70 = arith.constant 0.000000e+00 : f32
      %124 = vector.broadcast %cst_70 : f32 to vector<4x128xf32>
      %c0_71 = arith.constant 0 : index
      %c0_72 = arith.constant 0 : index
      %125 = vector.load %arg7[%c0_71, %c0_72] : memref<4x128xf32, #tpu.memory_space<vmem>>, vector<4x128xf32>
      tpu.vector_store %arg7[%c0_71, %c0_72], %124 {strides = array<i32>} : memref<4x128xf32, #tpu.memory_space<vmem>>, vector<4x128xf32>,
      %cst_73 = arith.constant 0.000000e+00 : f32
      %126 = vector.broadcast %cst_73 : f32 to vector<4x128xf32>
      %c0_74 = arith.constant 0 : index
      %c0_75 = arith.constant 0 : index
      %127 = vector.load %arg8[%c0_74, %c0_75] : memref<4x128xf32, #tpu.memory_space<vmem>>, vector<4x128xf32>
      tpu.vector_store %arg8[%c0_74, %c0_75], %126 {strides = array<i32>} : memref<4x128xf32, #tpu.memory_space<vmem>>, vector<4x128xf32>,
    } else {
    }
    %c0 = arith.constant 0 : index
    %c0_1 = arith.constant 0 : index
    %c0_2 = arith.constant 0 : index
    %c0_3 = arith.constant 0 : index
    %3 = vector.load %arg3[%c0, %c0_1, %c0_2, %c0_3] : memref<1x4x32x128xf32, #tpu.memory_space<vmem>>, vector<1x1x32x128xf32>
    %4 = vector.shape_cast %3 : vector<1x1x32x128xf32> to vector<32x128xf32>
    %c0_4 = arith.constant 0 : index
    %c1 = arith.constant 1 : index
    %c0_5 = arith.constant 0 : index
    %c0_6 = arith.constant 0 : index
    %5 = vector.load %arg3[%c0_4, %c1, %c0_5, %c0_6] : memref<1x4x32x128xf32, #tpu.memory_space<vmem>>, vector<1x1x32x128xf32>
    %6 = vector.shape_cast %5 : vector<1x1x32x128xf32> to vector<32x128xf32>
    %c0_7 = arith.constant 0 : index
    %c2 = arith.constant 2 : index
    %c0_8 = arith.constant 0 : index
    %c0_9 = arith.constant 0 : index
    %7 = vector.load %arg3[%c0_7, %c2, %c0_8, %c0_9] : memref<1x4x32x128xf32, #tpu.memory_space<vmem>>, vector<1x1x32x128xf32>
    %8 = vector.shape_cast %7 : vector<1x1x32x128xf32> to vector<32x128xf32>
    %c0_10 = arith.constant 0 : index
    %c3 = arith.constant 3 : index
    %c0_11 = arith.constant 0 : index
    %c0_12 = arith.constant 0 : index
    %9 = vector.load %arg3[%c0_10, %c3, %c0_11, %c0_12] : memref<1x4x32x128xf32, #tpu.memory_space<vmem>>, vector<1x1x32x128xf32>
    %10 = vector.shape_cast %9 : vector<1x1x32x128xf32> to vector<32x128xf32>
    %11 = arith.maximumf %4, %6 : vector<32x128xf32>
    %12 = arith.maximumf %11, %8 : vector<32x128xf32>
    %13 = arith.maximumf %12, %10 : vector<32x128xf32>
    %14 = arith.subf %4, %13 : vector<32x128xf32>
    %15 = math.exp %14 : vector<32x128xf32>
    %16 = arith.subf %6, %13 : vector<32x128xf32>
    %17 = math.exp %16 : vector<32x128xf32>
    %18 = arith.subf %8, %13 : vector<32x128xf32>
    %19 = math.exp %18 : vector<32x128xf32>
    %20 = arith.subf %10, %13 : vector<32x128xf32>
    %21 = math.exp %20 : vector<32x128xf32>
    %22 = arith.addf %15, %17 : vector<32x128xf32>
    %23 = arith.addf %22, %19 : vector<32x128xf32>
    %24 = arith.addf %23, %21 : vector<32x128xf32>
    %25 = tpu.reciprocal %24 : vector<32x128xf32> -> vector<32x128xf32>
    %26 = arith.mulf %15, %25 : vector<32x128xf32>
    %27 = arith.mulf %17, %25 : vector<32x128xf32>
    %28 = arith.mulf %19, %25 : vector<32x128xf32>
    %29 = arith.mulf %21, %25 : vector<32x128xf32>
    %c0_13 = arith.constant 0 : index
    %c0_14 = arith.constant 0 : index
    %c0_15 = arith.constant 0 : index
    %c0_16 = arith.constant 0 : index
    %30 = vector.load %arg4[%c0_13, %c0_14, %c0_15, %c0_16] : memref<1x1x32x128xi8, #tpu.memory_space<vmem>>, vector<1x1x32x128xi8>
    %31 = vector.shape_cast %30 : vector<1x1x32x128xi8> to vector<32x128xi8>
    %32 = arith.extsi %31 : vector<32x128xi8> to vector<32x128xi32>
    %c0_i32_17 = arith.constant 0 : i32
    %33 = vector.broadcast %c0_i32_17 : i32 to vector<32x128xi32>
    %34 = arith.cmpi eq, %32, %33 : vector<32x128xi32>
    %c0_18 = arith.constant 0 : index
    %c0_19 = arith.constant 0 : index
    %35 = vector.load %arg7[%c0_18, %c0_19] : memref<4x128xf32, #tpu.memory_space<vmem>>, vector<1x128xf32>
    %36 = vector.shape_cast %35 : vector<1x128xf32> to vector<128xf32>
    %cst = arith.constant 0.000000e+00 : f32
    %37 = vector.broadcast %cst : f32 to vector<32x128xf32>
    %38 = arith.select %34, %26, %37 : vector<32x128xi1>, vector<32x128xf32>
    %cst_20 = arith.constant dense<0.000000e+00> : vector<128xf32>
    %39 = vector.multi_reduction <add>, %38, %cst_20 [0] : vector<32x128xf32> to vector<128xf32>
    %40 = arith.addf %36, %39 : vector<128xf32>
    %c0_21 = arith.constant 0 : index
    %c0_22 = arith.constant 0 : index
    %41 = vector.load %arg7[%c0_21, %c0_22] : memref<4x128xf32, #tpu.memory_space<vmem>>, vector<1x128xf32>
    %42 = vector.shape_cast %41 : vector<1x128xf32> to vector<128xf32>
    %43 = vector.shape_cast %40 : vector<128xf32> to vector<1x128xf32>
    tpu.vector_store %arg7[%c0_21, %c0_22], %43 {strides = array<i32>} : memref<4x128xf32, #tpu.memory_space<vmem>>, vector<1x128xf32>,
    %c0_23 = arith.constant 0 : index
    %c0_24 = arith.constant 0 : index
    %44 = vector.load %arg8[%c0_23, %c0_24] : memref<4x128xf32, #tpu.memory_space<vmem>>, vector<1x128xf32>
    %45 = vector.shape_cast %44 : vector<1x128xf32> to vector<128xf32>
    %cst_25 = arith.constant 1.000000e+00 : f32
    %46 = vector.broadcast %cst_25 : f32 to vector<32x128xf32>
    %47 = arith.select %34, %46, %26 : vector<32x128xi1>, vector<32x128xf32>
    %cst_26 = arith.constant dense<0.000000e+00> : vector<128xf32>
    %48 = vector.multi_reduction <add>, %47, %cst_26 [0] : vector<32x128xf32> to vector<128xf32>
    %49 = arith.addf %45, %48 : vector<128xf32>
    %c0_27 = arith.constant 0 : index
    %c0_28 = arith.constant 0 : index
    %50 = vector.load %arg8[%c0_27, %c0_28] : memref<4x128xf32, #tpu.memory_space<vmem>>, vector<1x128xf32>
    %51 = vector.shape_cast %50 : vector<1x128xf32> to vector<128xf32>
    %52 = vector.shape_cast %49 : vector<128xf32> to vector<1x128xf32>
    tpu.vector_store %arg8[%c0_27, %c0_28], %52 {strides = array<i32>} : memref<4x128xf32, #tpu.memory_space<vmem>>, vector<1x128xf32>,
    %c1_i32 = arith.constant 1 : i32
    %53 = vector.broadcast %c1_i32 : i32 to vector<32x128xi32>
    %54 = arith.cmpi eq, %32, %53 : vector<32x128xi32>
    %c1_29 = arith.constant 1 : index
    %c0_30 = arith.constant 0 : index
    %55 = vector.load %arg7[%c1_29, %c0_30] : memref<4x128xf32, #tpu.memory_space<vmem>>, vector<1x128xf32>
    %56 = vector.shape_cast %55 : vector<1x128xf32> to vector<128xf32>
    %cst_31 = arith.constant 0.000000e+00 : f32
    %57 = vector.broadcast %cst_31 : f32 to vector<32x128xf32>
    %58 = arith.select %54, %27, %57 : vector<32x128xi1>, vector<32x128xf32>
    %cst_32 = arith.constant dense<0.000000e+00> : vector<128xf32>
    %59 = vector.multi_reduction <add>, %58, %cst_32 [0] : vector<32x128xf32> to vector<128xf32>
    %60 = arith.addf %56, %59 : vector<128xf32>
    %c1_33 = arith.constant 1 : index
    %c0_34 = arith.constant 0 : index
    %61 = vector.load %arg7[%c1_33, %c0_34] : memref<4x128xf32, #tpu.memory_space<vmem>>, vector<1x128xf32>
    %62 = vector.shape_cast %61 : vector<1x128xf32> to vector<128xf32>
    %63 = vector.shape_cast %60 : vector<128xf32> to vector<1x128xf32>
    tpu.vector_store %arg7[%c1_33, %c0_34], %63 {strides = array<i32>} : memref<4x128xf32, #tpu.memory_space<vmem>>, vector<1x128xf32>,
    %c1_35 = arith.constant 1 : index
    %c0_36 = arith.constant 0 : index
    %64 = vector.load %arg8[%c1_35, %c0_36] : memref<4x128xf32, #tpu.memory_space<vmem>>, vector<1x128xf32>
    %65 = vector.shape_cast %64 : vector<1x128xf32> to vector<128xf32>
    %cst_37 = arith.constant 1.000000e+00 : f32
    %66 = vector.broadcast %cst_37 : f32 to vector<32x128xf32>
    %67 = arith.select %54, %66, %27 : vector<32x128xi1>, vector<32x128xf32>
    %cst_38 = arith.constant dense<0.000000e+00> : vector<128xf32>
    %68 = vector.multi_reduction <add>, %67, %cst_38 [0] : vector<32x128xf32> to vector<128xf32>
    %69 = arith.addf %65, %68 : vector<128xf32>
    %c1_39 = arith.constant 1 : index
    %c0_40 = arith.constant 0 : index
    %70 = vector.load %arg8[%c1_39, %c0_40] : memref<4x128xf32, #tpu.memory_space<vmem>>, vector<1x128xf32>
    %71 = vector.shape_cast %70 : vector<1x128xf32> to vector<128xf32>
    %72 = vector.shape_cast %69 : vector<128xf32> to vector<1x128xf32>
    tpu.vector_store %arg8[%c1_39, %c0_40], %72 {strides = array<i32>} : memref<4x128xf32, #tpu.memory_space<vmem>>, vector<1x128xf32>,
    %c2_i32 = arith.constant 2 : i32
    %73 = vector.broadcast %c2_i32 : i32 to vector<32x128xi32>
    %74 = arith.cmpi eq, %32, %73 : vector<32x128xi32>
    %c2_41 = arith.constant 2 : index
    %c0_42 = arith.constant 0 : index
    %75 = vector.load %arg7[%c2_41, %c0_42] : memref<4x128xf32, #tpu.memory_space<vmem>>, vector<1x128xf32>
    %76 = vector.shape_cast %75 : vector<1x128xf32> to vector<128xf32>
    %cst_43 = arith.constant 0.000000e+00 : f32
    %77 = vector.broadcast %cst_43 : f32 to vector<32x128xf32>
    %78 = arith.select %74, %28, %77 : vector<32x128xi1>, vector<32x128xf32>
    %cst_44 = arith.constant dense<0.000000e+00> : vector<128xf32>
    %79 = vector.multi_reduction <add>, %78, %cst_44 [0] : vector<32x128xf32> to vector<128xf32>
    %80 = arith.addf %76, %79 : vector<128xf32>
    %c2_45 = arith.constant 2 : index
    %c0_46 = arith.constant 0 : index
    %81 = vector.load %arg7[%c2_45, %c0_46] : memref<4x128xf32, #tpu.memory_space<vmem>>, vector<1x128xf32>
    %82 = vector.shape_cast %81 : vector<1x128xf32> to vector<128xf32>
    %83 = vector.shape_cast %80 : vector<128xf32> to vector<1x128xf32>
    tpu.vector_store %arg7[%c2_45, %c0_46], %83 {strides = array<i32>} : memref<4x128xf32, #tpu.memory_space<vmem>>, vector<1x128xf32>,
    %c2_47 = arith.constant 2 : index
    %c0_48 = arith.constant 0 : index
    %84 = vector.load %arg8[%c2_47, %c0_48] : memref<4x128xf32, #tpu.memory_space<vmem>>, vector<1x128xf32>
    %85 = vector.shape_cast %84 : vector<1x128xf32> to vector<128xf32>
    %cst_49 = arith.constant 1.000000e+00 : f32
    %86 = vector.broadcast %cst_49 : f32 to vector<32x128xf32>
    %87 = arith.select %74, %86, %28 : vector<32x128xi1>, vector<32x128xf32>
    %cst_50 = arith.constant dense<0.000000e+00> : vector<128xf32>
    %88 = vector.multi_reduction <add>, %87, %cst_50 [0] : vector<32x128xf32> to vector<128xf32>
    %89 = arith.addf %85, %88 : vector<128xf32>
    %c2_51 = arith.constant 2 : index
    %c0_52 = arith.constant 0 : index
    %90 = vector.load %arg8[%c2_51, %c0_52] : memref<4x128xf32, #tpu.memory_space<vmem>>, vector<1x128xf32>
    %91 = vector.shape_cast %90 : vector<1x128xf32> to vector<128xf32>
    %92 = vector.shape_cast %89 : vector<128xf32> to vector<1x128xf32>
    tpu.vector_store %arg8[%c2_51, %c0_52], %92 {strides = array<i32>} : memref<4x128xf32, #tpu.memory_space<vmem>>, vector<1x128xf32>,
    %c3_i32 = arith.constant 3 : i32
    %93 = vector.broadcast %c3_i32 : i32 to vector<32x128xi32>
    %94 = arith.cmpi eq, %32, %93 : vector<32x128xi32>
    %c3_53 = arith.constant 3 : index
    %c0_54 = arith.constant 0 : index
    %95 = vector.load %arg7[%c3_53, %c0_54] : memref<4x128xf32, #tpu.memory_space<vmem>>, vector<1x128xf32>
    %96 = vector.shape_cast %95 : vector<1x128xf32> to vector<128xf32>
    %cst_55 = arith.constant 0.000000e+00 : f32
    %97 = vector.broadcast %cst_55 : f32 to vector<32x128xf32>
    %98 = arith.select %94, %29, %97 : vector<32x128xi1>, vector<32x128xf32>
    %cst_56 = arith.constant dense<0.000000e+00> : vector<128xf32>
    %99 = vector.multi_reduction <add>, %98, %cst_56 [0] : vector<32x128xf32> to vector<128xf32>
    %100 = arith.addf %96, %99 : vector<128xf32>
    %c3_57 = arith.constant 3 : index
    %c0_58 = arith.constant 0 : index
    %101 = vector.load %arg7[%c3_57, %c0_58] : memref<4x128xf32, #tpu.memory_space<vmem>>, vector<1x128xf32>
    %102 = vector.shape_cast %101 : vector<1x128xf32> to vector<128xf32>
    %103 = vector.shape_cast %100 : vector<128xf32> to vector<1x128xf32>
    tpu.vector_store %arg7[%c3_57, %c0_58], %103 {strides = array<i32>} : memref<4x128xf32, #tpu.memory_space<vmem>>, vector<1x128xf32>,
    %c3_59 = arith.constant 3 : index
    %c0_60 = arith.constant 0 : index
    %104 = vector.load %arg8[%c3_59, %c0_60] : memref<4x128xf32, #tpu.memory_space<vmem>>, vector<1x128xf32>
    %105 = vector.shape_cast %104 : vector<1x128xf32> to vector<128xf32>
    %cst_61 = arith.constant 1.000000e+00 : f32
    %106 = vector.broadcast %cst_61 : f32 to vector<32x128xf32>
    %107 = arith.select %94, %106, %29 : vector<32x128xi1>, vector<32x128xf32>
    %cst_62 = arith.constant dense<0.000000e+00> : vector<128xf32>
    %108 = vector.multi_reduction <add>, %107, %cst_62 [0] : vector<32x128xf32> to vector<128xf32>
    %109 = arith.addf %105, %108 : vector<128xf32>
    %c3_63 = arith.constant 3 : index
    %c0_64 = arith.constant 0 : index
    %110 = vector.load %arg8[%c3_63, %c0_64] : memref<4x128xf32, #tpu.memory_space<vmem>>, vector<1x128xf32>
    %111 = vector.shape_cast %110 : vector<1x128xf32> to vector<128xf32>
    %112 = vector.shape_cast %109 : vector<128xf32> to vector<1x128xf32>
    tpu.vector_store %arg8[%c3_63, %c0_64], %112 {strides = array<i32>} : memref<4x128xf32, #tpu.memory_space<vmem>>, vector<1x128xf32>,
    %c1_i32_65 = arith.constant 1 : i32
    %113 = arith.muli %arg1, %c1_i32_65 : i32
    %114 = arith.addi %113, %arg2 : i32
    %c32_i32 = arith.constant 32 : i32
    %115 = arith.muli %114, %c32_i32 : i32
    %c32_i32_66 = arith.constant 32 : i32
    %116 = arith.addi %115, %c32_i32_66 : i32
    %c128_i32 = arith.constant 128 : i32
    %117 = arith.muli %116, %c128_i32 : i32
    %c256_i32 = arith.constant 256 : i32
    %118 = arith.cmpi sgt, %117, %c256_i32 : i32
    %119 = arith.extui %118 : i1 to i32
    %c0_i32_67 = arith.constant 0 : i32
    %120 = arith.cmpi ne, %119, %c0_i32_67 : i32
    scf.if %120 {
      %124 = tpu.iota {dimensions = array<i32: 0>} : vector<32x128xi32>
      %125 = tpu.iota {dimensions = array<i32: 1>} : vector<32x128xi32>
      %126 = vector.broadcast %115 : i32 to vector<32x128xi32>
      %127 = arith.addi %126, %124 : vector<32x128xi32>
      %c128_i32_70 = arith.constant 128 : i32
      %128 = vector.broadcast %c128_i32_70 : i32 to vector<32x128xi32>
      %129 = arith.muli %127, %128 : vector<32x128xi32>
      %130 = arith.addi %129, %125 : vector<32x128xi32>
      %c256_i32_71 = arith.constant 256 : i32
      %131 = vector.broadcast %c256_i32_71 : i32 to vector<32x128xi32>
      %132 = arith.cmpi sge, %130, %131 : vector<32x128xi32>
      %c0_72 = arith.constant 0 : index
      %c0_73 = arith.constant 0 : index
      %133 = vector.load %arg8[%c0_72, %c0_73] : memref<4x128xf32, #tpu.memory_space<vmem>>, vector<1x128xf32>
      %134 = vector.shape_cast %133 : vector<1x128xf32> to vector<128xf32>
      %cst_74 = arith.constant 0.000000e+00 : f32
      %135 = vector.broadcast %cst_74 : f32 to vector<32x128xf32>
      %136 = arith.select %132, %26, %135 : vector<32x128xi1>, vector<32x128xf32>
      %cst_75 = arith.constant dense<0.000000e+00> : vector<128xf32>
      %137 = vector.multi_reduction <add>, %136, %cst_75 [0] : vector<32x128xf32> to vector<128xf32>
      %138 = arith.subf %134, %137 : vector<128xf32>
      %c0_76 = arith.constant 0 : index
      %c0_77 = arith.constant 0 : index
      %139 = vector.load %arg8[%c0_76, %c0_77] : memref<4x128xf32, #tpu.memory_space<vmem>>, vector<1x128xf32>
      %140 = vector.shape_cast %139 : vector<1x128xf32> to vector<128xf32>
      %141 = vector.shape_cast %138 : vector<128xf32> to vector<1x128xf32>
      tpu.vector_store %arg8[%c0_76, %c0_77], %141 {strides = array<i32>} : memref<4x128xf32, #tpu.memory_space<vmem>>, vector<1x128xf32>,
      %c1_78 = arith.constant 1 : index
      %c0_79 = arith.constant 0 : index
      %142 = vector.load %arg8[%c1_78, %c0_79] : memref<4x128xf32, #tpu.memory_space<vmem>>, vector<1x128xf32>
      %143 = vector.shape_cast %142 : vector<1x128xf32> to vector<128xf32>
      %cst_80 = arith.constant 0.000000e+00 : f32
      %144 = vector.broadcast %cst_80 : f32 to vector<32x128xf32>
      %145 = arith.select %132, %27, %144 : vector<32x128xi1>, vector<32x128xf32>
      %cst_81 = arith.constant dense<0.000000e+00> : vector<128xf32>
      %146 = vector.multi_reduction <add>, %145, %cst_81 [0] : vector<32x128xf32> to vector<128xf32>
      %147 = arith.subf %143, %146 : vector<128xf32>
      %c1_82 = arith.constant 1 : index
      %c0_83 = arith.constant 0 : index
      %148 = vector.load %arg8[%c1_82, %c0_83] : memref<4x128xf32, #tpu.memory_space<vmem>>, vector<1x128xf32>
      %149 = vector.shape_cast %148 : vector<1x128xf32> to vector<128xf32>
      %150 = vector.shape_cast %147 : vector<128xf32> to vector<1x128xf32>
      tpu.vector_store %arg8[%c1_82, %c0_83], %150 {strides = array<i32>} : memref<4x128xf32, #tpu.memory_space<vmem>>, vector<1x128xf32>,
      %c2_84 = arith.constant 2 : index
      %c0_85 = arith.constant 0 : index
      %151 = vector.load %arg8[%c2_84, %c0_85] : memref<4x128xf32, #tpu.memory_space<vmem>>, vector<1x128xf32>
      %152 = vector.shape_cast %151 : vector<1x128xf32> to vector<128xf32>
      %cst_86 = arith.constant 0.000000e+00 : f32
      %153 = vector.broadcast %cst_86 : f32 to vector<32x128xf32>
      %154 = arith.select %132, %28, %153 : vector<32x128xi1>, vector<32x128xf32>
      %cst_87 = arith.constant dense<0.000000e+00> : vector<128xf32>
      %155 = vector.multi_reduction <add>, %154, %cst_87 [0] : vector<32x128xf32> to vector<128xf32>
      %156 = arith.subf %152, %155 : vector<128xf32>
      %c2_88 = arith.constant 2 : index
      %c0_89 = arith.constant 0 : index
      %157 = vector.load %arg8[%c2_88, %c0_89] : memref<4x128xf32, #tpu.memory_space<vmem>>, vector<1x128xf32>
      %158 = vector.shape_cast %157 : vector<1x128xf32> to vector<128xf32>
      %159 = vector.shape_cast %156 : vector<128xf32> to vector<1x128xf32>
      tpu.vector_store %arg8[%c2_88, %c0_89], %159 {strides = array<i32>} : memref<4x128xf32, #tpu.memory_space<vmem>>, vector<1x128xf32>,
      %c3_90 = arith.constant 3 : index
      %c0_91 = arith.constant 0 : index
      %160 = vector.load %arg8[%c3_90, %c0_91] : memref<4x128xf32, #tpu.memory_space<vmem>>, vector<1x128xf32>
      %161 = vector.shape_cast %160 : vector<1x128xf32> to vector<128xf32>
      %cst_92 = arith.constant 0.000000e+00 : f32
      %162 = vector.broadcast %cst_92 : f32 to vector<32x128xf32>
      %163 = arith.select %132, %29, %162 : vector<32x128xi1>, vector<32x128xf32>
      %cst_93 = arith.constant dense<0.000000e+00> : vector<128xf32>
      %164 = vector.multi_reduction <add>, %163, %cst_93 [0] : vector<32x128xf32> to vector<128xf32>
      %165 = arith.subf %161, %164 : vector<128xf32>
      %c3_94 = arith.constant 3 : index
      %c0_95 = arith.constant 0 : index
      %166 = vector.load %arg8[%c3_94, %c0_95] : memref<4x128xf32, #tpu.memory_space<vmem>>, vector<1x128xf32>
      %167 = vector.shape_cast %166 : vector<1x128xf32> to vector<128xf32>
      %168 = vector.shape_cast %165 : vector<128xf32> to vector<1x128xf32>
      tpu.vector_store %arg8[%c3_94, %c0_95], %168 {strides = array<i32>} : memref<4x128xf32, #tpu.memory_space<vmem>>, vector<1x128xf32>,
    } else {
    }
    %c0_i32_68 = arith.constant 0 : i32
    %121 = arith.cmpi eq, %arg2, %c0_i32_68 : i32
    %122 = arith.extui %121 : i1 to i32
    %c0_i32_69 = arith.constant 0 : i32
    %123 = arith.cmpi ne, %122, %c0_i32_69 : i32
    scf.if %123 {
      %c0_70 = arith.constant 0 : index
      %c0_71 = arith.constant 0 : index
      %124 = vector.load %arg7[%c0_70, %c0_71] : memref<4x128xf32, #tpu.memory_space<vmem>>, vector<4x128xf32>
      %cst_72 = arith.constant dense<0.000000e+00> : vector<4xf32>
      %125 = vector.multi_reduction <add>, %124, %cst_72 [1] : vector<4x128xf32> to vector<4xf32>
      %126 = vector.shape_cast %125 : vector<4xf32> to vector<4x1xf32>
      %127 = vector.shape_cast %126 : vector<4x1xf32> to vector<1x1x4x1xf32>
      %c0_73 = arith.constant 0 : index
      %c0_74 = arith.constant 0 : index
      %c0_75 = arith.constant 0 : index
      %c0_76 = arith.constant 0 : index
      %128 = vector.load %arg5[%c0_73, %c0_74, %c0_75, %c0_76] : memref<1x1x4x1xf32, #tpu.memory_space<vmem>>, vector<1x1x4x1xf32>
      tpu.vector_store %arg5[%c0_73, %c0_74, %c0_75, %c0_76], %127 {strides = array<i32>} : memref<1x1x4x1xf32, #tpu.memory_space<vmem>>, vector<1x1x4x1xf32>,
      %c0_77 = arith.constant 0 : index
      %c0_78 = arith.constant 0 : index
      %129 = vector.load %arg8[%c0_77, %c0_78] : memref<4x128xf32, #tpu.memory_space<vmem>>, vector<4x128xf32>
      %cst_79 = arith.constant dense<0.000000e+00> : vector<4xf32>
      %130 = vector.multi_reduction <add>, %129, %cst_79 [1] : vector<4x128xf32> to vector<4xf32>
      %131 = vector.shape_cast %130 : vector<4xf32> to vector<4x1xf32>
      %132 = vector.shape_cast %131 : vector<4x1xf32> to vector<1x1x4x1xf32>
      %c0_80 = arith.constant 0 : index
      %c0_81 = arith.constant 0 : index
      %c0_82 = arith.constant 0 : index
      %c0_83 = arith.constant 0 : index
      %133 = vector.load %arg6[%c0_80, %c0_81, %c0_82, %c0_83] : memref<1x1x4x1xf32, #tpu.memory_space<vmem>>, vector<1x1x4x1xf32>
      tpu.vector_store %arg6[%c0_80, %c0_81, %c0_82, %c0_83], %132 {strides = array<i32>} : memref<1x1x4x1xf32, #tpu.memory_space<vmem>>, vector<1x1x4x1xf32>,
    } else {
    }
    return
  }
  func.func @transform_0(%arg0: i32, %arg1: i32, %arg2: i32) -> (i32, i32, i32, i32) {
    %c1_i32 = arith.constant 1 : i32
    %0 = arith.muli %arg1, %c1_i32 : i32
    %1 = arith.addi %0, %arg2 : i32
    %c0_i32 = arith.constant 0 : i32
    %c0_i32_0 = arith.constant 0 : i32
    %c0_i32_1 = arith.constant 0 : i32
    return %arg0, %c0_i32, %1, %c0_i32_0 : i32, i32, i32, i32
  }
  func.func @transform_1(%arg0: i32, %arg1: i32, %arg2: i32) -> (i32, i32, i32, i32) {
    %c1_i32 = arith.constant 1 : i32
    %0 = arith.muli %arg1, %c1_i32 : i32
    %1 = arith.addi %0, %arg2 : i32
    %c0_i32 = arith.constant 0 : i32
    %c0_i32_0 = arith.constant 0 : i32
    %c0_i32_1 = arith.constant 0 : i32
    return %arg0, %c0_i32, %1, %c0_i32_0 : i32, i32, i32, i32
  }
  func.func @transform_2(%arg0: i32, %arg1: i32, %arg2: i32) -> (i32, i32, i32, i32) {
    %c0_i32 = arith.constant 0 : i32
    %c0_i32_0 = arith.constant 0 : i32
    %c0_i32_1 = arith.constant 0 : i32
    return %arg0, %arg1, %c0_i32, %c0_i32_0 : i32, i32, i32, i32
  }
  func.func @transform_3(%arg0: i32, %arg1: i32, %arg2: i32) -> (i32, i32, i32, i32) {
    %c0_i32 = arith.constant 0 : i32
    %c0_i32_0 = arith.constant 0 : i32
    %c0_i32_1 = arith.constant 0 : i32
    return %arg0, %arg1, %c0_i32, %c0_i32_0 : i32, i32, i32, i32
  }
}

</mosaic_0001>

<bundles_post_ra>
// kernel: jaccard_loss.1
= control target key start
LH: loop header
LB: loop body
LE: loop exit
PB: predicated region body
PF: predicated region fallthrough
CT: control target
= control target key end

     0   :  { %s921_s12 = smov 0   ;;  %s923_s13 = smov 0   ;;  %s1223_s0 = inlined_call_operand.vmem [shape: f32[2,4,32,128], index: 0, kind: input, shape index: {}]   ;;  %s1224_s1 = inlined_call_operand.vmem [shape: s8[2,1,32,128], index: 1, kind: input, shape index: {}]   ;;  %s1225_s2 = inlined_call_operand.vmem [shape: f32[2,1,4,1], index: 2, kind: output, shape index: {0}]   ;;  %s1226_s3 = inlined_call_operand.vmem [shape: f32[2,1,4,1], index: 3, kind: output, shape index: {1}]  }
   0x1   :  { %s925_s14 = smov 0  }
   0x2 LB: > { %s33_s15 = sadd.s32 1, %s894_s13  ;;  %p790_p0 = scmp.ge.s32.totalorder %s898_s14, 1  ;;  %s898_s14 = sphi %s925_s14, %s14_s14   ;;  %s894_s13 = sphi %s923_s13, %s1228_s13   ;;  %s890_s12 = sphi %s921_s12, %s1227_s12  }
   0x3   : > { %p35_p1 = scmp.ge.s32.totalorder %s33_s15, 2  ;;  %p192_p2 = scmp.lt.s32.totalorder %s898_s14, 3 }
   0x5   : > { %s1230_s15 = smov (%p35_p1, %s33_s15), 0  ;;  %p193_p3 = pnand %p790_p0, %p192_p2 }
   0x6   : > { %p240_p4 = scmp.lt.s32.totalorder (!%p193_p3), %s890_s12, 1  ;;  %v900_v0 = vmov (!%p193_p3), 0.0  }
   0x7   : > { %196 = sbr.rel (%p193_p3) target bundleno = 275 (0x113), region = 28  ;;  %277 = vst [vmem:[#allocation2] sm:$0xf] (!%p193_p3), %v900_v0  ;;  %278 = vst [vmem:[#allocation3] sm:$0xf] (!%p193_p3), %v900_v0 }
   0xe   : > { %s1232_s12 = smov (!%p240_p4, %s890_s12), 1 }
   0xf   : > { %s810_s16 = sshll.u32 %s1232_s12, 7  ;;  %s793_s20 = sshll.u32 %s1232_s12, 3 }
  0x10   : > { %s247_s19 = scalar_lea.vmem %s1223_s0, %s810_s16  ;;  %s257_s23 = scalar_lea.vmem %s1224_s1, %s793_s20 }
  0x11   : > { %v279_v1 = vld [vmem:[%s247_s19] sm:$0xff]  ;;  %v280_v2 = vld [vmem:[%s247_s19 + $0x8] sm:$0xff]  ;;  %v281_v3 = vld [vmem:[%s247_s19 + $0x10] sm:$0xff]  ;;  %s794_s24 = sshll.u32 %s1232_s12, 2 }
  0x12   : > { %v282_v4 = vld [vmem:[%s247_s19 + $0x18] sm:$0xff]  ;;  %v796_v5 = vld [vmem:[%s247_s19 + $0x20] sm:$0xff]  ;;  %v797_v6 = vld [vmem:[%s247_s19 + $0x28] sm:$0xff]  ;;  %s265_s27 = scalar_lea.vmem %s1225_s2, %s794_s24  ;;  %s272_s30 = scalar_lea.vmem %s1226_s3, %s794_s24 }
  0x13   : > { %v798_v7 = vld [vmem:[%s247_s19 + $0x30] sm:$0xff]  ;;  %v799_v8 = vld [vmem:[%s247_s19 + $0x38] sm:$0xff]  ;;  %v800_v9 = vld [vmem:[%s247_s19 + $0x40] sm:$0xff]  ;;  %v298_v10 = vmax.f32 %v279_v1, %v796_v5  ;;  %v299_v11 = vmax.f32 %v280_v2, %v797_v6 }
  0x14   : > { %v801_v12 = vld [vmem:[%s247_s19 + $0x48] sm:$0xff]  ;;  %v802_v13 = vld [vmem:[%s247_s19 + $0x50] sm:$0xff]  ;;  %v803_v14 = vld [vmem:[%s247_s19 + $0x58] sm:$0xff]  ;;  %v300_v15 = vmax.f32 %v281_v3, %v798_v7  ;;  %v301_v16 = vmax.f32 %v282_v4, %v799_v8 }
  0x15   : > { %v804_v17 = vld [vmem:[%s247_s19 + $0x60] sm:$0xff]  ;;  %v805_v18 = vld [vmem:[%s247_s19 + $0x68] sm:$0xff]  ;;  %v806_v19 = vld [vmem:[%s247_s19 + $0x70] sm:$0xff]  ;;  %v302_v20 = vmax.f32 %v298_v10, %v800_v9  ;;  %v303_v21 = vmax.f32 %v299_v11, %v801_v12 }
  0x16   : > { %v807_v22 = vld [vmem:[%s247_s19 + $0x78] sm:$0xff]  ;;  %v304_v23 = vmax.f32 %v300_v15, %v802_v13  ;;  %v305_v24 = vmax.f32 %v301_v16, %v803_v14 }
  0x17   : > { %v306_v25 = vmax.f32 %v302_v20, %v804_v17  ;;  %v307_v26 = vmax.f32 %v303_v21, %v805_v18 }
  0x18   : > { %v308_v27 = vmax.f32 %v304_v23, %v806_v19  ;;  %v309_v28 = vmax.f32 %v305_v24, %v807_v22 }
  0x19   : > { %v310_v29 = vsub.f32 %v279_v1, %v306_v25  ;;  %v311_v30 = vsub.f32 %v280_v2, %v307_v26  ;;  %v322_v31 = vsub.f32 %v796_v5, %v306_v25  ;;  %v323_v34 = vsub.f32 %v797_v6, %v307_v26 }
  0x1a   : > { %v312_v32 = vsub.f32 %v281_v3, %v308_v27  ;;  %v313_v33 = vsub.f32 %v282_v4, %v309_v28  ;;  %v324_v37 = vsub.f32 %v798_v7, %v308_v27  ;;  %v325_v40 = vsub.f32 %v799_v8, %v309_v28 }
  0x1b   : > { %v314_v35 = vmul.f32 1.442695, %v310_v29  ;;  %v316_v36 = vmul.f32 1.442695, %v311_v30  ;;  %v326_v41 = vmul.f32 1.442695, %v322_v31  ;;  %v334_v42 = vsub.f32 %v800_v9, %v306_v25 }
  0x1c   : > { %v318_v38 = vmul.f32 1.442695, %v312_v32  ;;  %v320_v39 = vmul.f32 1.442695, %v313_v33  ;;  %v328_v43 = vmul.f32 1.442695, %v323_v34  ;;  %v335_v44 = vsub.f32 %v801_v12, %v307_v26 }
  0x1d   : > { %836 = vpow2.f32 %v314_v35  ;;  %v330_v45 = vmul.f32 1.442695, %v324_v37  ;;  %v336_v46 = vsub.f32 %v802_v13, %v308_v27  ;;  %v332_v47 = vmul.f32 1.442695, %v325_v40  ;;  %v390_v29 = vld [vmem:[%s257_s23] sm:$0xff] }
  0x1e   : > { %838 = vpow2.f32 %v316_v36  ;;  %v337_v48 = vsub.f32 %v803_v14, %v309_v28  ;;  %v338_v49 = vmul.f32 1.442695, %v334_v42  ;;  %v346_v50 = vsub.f32 %v804_v17, %v306_v25 }
  0x1f   : > { %840 = vpow2.f32 %v318_v38  ;;  %v340_v51 = vmul.f32 1.442695, %v335_v44  ;;  %v347_v52 = vsub.f32 %v805_v18, %v307_v26  ;;  %v342_v53 = vmul.f32 1.442695, %v336_v46 }
  0x20   : > { %842 = vpow2.f32 %v320_v39  ;;  %v348_v54 = vsub.f32 %v806_v19, %v308_v27  ;;  %v344_v55 = vmul.f32 1.442695, %v337_v48  ;;  %v349_v56 = vsub.f32 %v807_v22, %v309_v28 }
  0x21   : > { %844 = vpow2.f32 %v326_v41  ;;  %v350_v57 = vmul.f32 1.442695, %v346_v50  ;;  %v352_v58 = vmul.f32 1.442695, %v347_v52  ;;  %v547_v2 = vlaneseq }
  0x22   : > { %846 = vpow2.f32 %v328_v43  ;;  %v354_v60 = vmul.f32 1.442695, %v348_v54  ;;  %v356_v62 = vmul.f32 1.442695, %v349_v56  ;;  %v982_v36 = vunpack.c.0.s8 %v390_v29 }
  0x23   : > { %848 = vpow2.f32 %v330_v45  ;;  %v548_v11 = vshrl.u32 %v547_v2, 7  ;;  %v553_v33 = vand.u32 127, %v547_v2  ;;  %v984_v37 = vunpack.c.1.s8 %v390_v29 }
  0x24   : > { %850 = vpow2.f32 %v332_v47  ;;  %v986_v38 = vunpack.c.2.s8 %v390_v29  ;;  %v988_v39 = vunpack.c.3.s8 %v390_v29  ;;  %vm395_vm0 = vcmp.eq.s32.totalorder %v982_v36, 0 }
  0x25   : > { %852 = vpow2.f32 %v338_v49  ;;  %v549_v20 = vadd.s32 8, %v548_v11  ;;  %v550_v23 = vadd.s32 16, %v548_v11  ;;  %v551_v24 = vadd.s32 24, %v548_v11 }
  0x26   : > { %854 = vpow2.f32 %v340_v51  ;;  %v559_v31 = vmul.u32 128, %v548_v11  ;;  %vm396_vm1 = vcmp.eq.s32.totalorder %v984_v37, 0  ;;  %vm397_vm2 = vcmp.eq.s32.totalorder %v986_v38, 0 }
  0x27   : > { %v945_v59 = vpop.eup %836  ;;  %856 = vpow2.f32 %v342_v53  ;;  %v560_v32 = vmul.u32 128, %v549_v20  ;;  %v561_v34 = vmul.u32 128, %v550_v23  ;;  %vm398_vm3 = vcmp.eq.s32.totalorder %v988_v39, 0 }
  0x28   : > { %v947_v61 = vpop.eup %838  ;;  %858 = vpow2.f32 %v344_v55  ;;  %v562_v35 = vmul.u32 128, %v551_v24  ;;  %v990_v40 = vadd.s32 %v559_v31, %v553_v33  ;;  %vm431_vm4 = vcmp.eq.s32.totalorder %v982_v36, 1 }
  0x29   : > { %v949_v63 = vpop.eup %840  ;;  %860 = vpow2.f32 %v350_v57  ;;  %v992_v41 = vadd.s32 %v560_v32, %v553_v33  ;;  %v994_v42 = vadd.s32 %v561_v34, %v553_v33  ;;  %vm432_vm5 = vcmp.eq.s32.totalorder %v984_v37, 1 }
  0x2a   : > { %v951_v0 = vpop.eup %842  ;;  %862 = vpow2.f32 %v352_v58  ;;  %v999_v43 = vadd.s32 %v562_v35, %v553_v33  ;;  %vm433_vm6 = vcmp.eq.s32.totalorder %v986_v38, 1  ;;  %vm434_vm7 = vcmp.eq.s32.totalorder %v988_v39, 1 }
  0x2b   : > { %v953_v1 = vpop.eup %844  ;;  %864 = vpow2.f32 %v354_v60  ;;  %vm467_vm8 = vcmp.eq.s32.totalorder %v982_v36, 2  ;;  %vm468_vm9 = vcmp.eq.s32.totalorder %v984_v37, 2  ;;  %vm469_vm10 = vcmp.eq.s32.totalorder %v986_v38, 2 }
  0x2c   : > { %v955_v3 = vpop.eup %846  ;;  %866 = vpow2.f32 %v356_v62  ;;  %v358_v4 = vadd.f32 %v953_v1, %v945_v59  ;;  %vm470_vm11 = vcmp.eq.s32.totalorder %v988_v39, 2  ;;  %vm503_vm12 = vcmp.eq.s32.totalorder %v982_v36, 3  ;;  %v507_v36 = vld [vmem:[#allocation2 + $0x3] sm:$0x1] }
  0x2d   : > { %v959_v5 = vpop.eup %848  ;;  %v359_v6 = vadd.f32 %v955_v3, %v947_v61  ;;  %vm504_vm13 = vcmp.eq.s32.totalorder %v984_v37, 3  ;;  %vm505_vm14 = vcmp.eq.s32.totalorder %v986_v38, 3  ;;  %vm506_vm15 = vcmp.eq.s32.totalorder %v988_v39, 3 }
  0x2e   : > { %v963_v7 = vpop.eup %850  ;;  %v360_v8 = vadd.f32 %v959_v5, %v949_v63 }
  0x2f   : > { %v853_v9 = vpop.eup %852  ;;  %v361_v10 = vadd.f32 %v963_v7, %v951_v0 }
  0x30   : > { %v969_v12 = vpop.eup %854  ;;  %v362_v13 = vadd.f32 %v853_v9, %v358_v4 }
  0x31   : > { %v972_v14 = vpop.eup %856  ;;  %v363_v15 = vadd.f32 %v969_v12, %v359_v6 }
  0x32   : > { %v975_v16 = vpop.eup %858  ;;  %v364_v17 = vadd.f32 %v972_v14, %v360_v8 }
  0x33   : > { %v861_v18 = vpop.eup %860  ;;  %v365_v19 = vadd.f32 %v975_v16, %v361_v10 }
  0x34   : > { %v863_v21 = vpop.eup %862  ;;  %v366_v22 = vadd.f32 %v861_v18, %v362_v13 }
  0x35   : > { %v865_v25 = vpop.eup %864  ;;  %v367_v26 = vadd.f32 %v863_v21, %v363_v15 }
  0x36   : > { %v867_v27 = vpop.eup %866  ;;  %v368_v28 = vadd.f32 %v865_v25, %v364_v17  ;;  %868 = vrcp.f32 %v366_v22 }
  0x37   : > { %v369_v30 = vadd.f32 %v867_v27, %v365_v19  ;;  %870 = vrcp.f32 %v367_v26 }
  0x38   : > { %872 = vrcp.f32 %v368_v28 }
  0x39   : > { %874 = vrcp.f32 %v369_v30 }
  0x40   : > { %v869_v44 = vpop.eup %868 }
  0x41   : > { %v871_v45 = vpop.eup %870  ;;  %v1014_v46 = vmul.f32 %v869_v44, %v945_v59  ;;  %v1017_v47 = vmul.f32 %v869_v44, %v953_v1  ;;  %v1019_v48 = vmul.f32 %v869_v44, %v853_v9  ;;  %v1021_v49 = vmul.f32 %v869_v44, %v861_v18 }
  0x42   : > { %v873_v50 = vpop.eup %872  ;;  %v1025_v51 = vmul.f32 %v871_v45, %v947_v61  ;;  %v1028_v52 = vmul.f32 %v871_v45, %v955_v3  ;;  %v1031_v53 = vmul.f32 %v871_v45, %v969_v12  ;;  %v1033_v54 = vmul.f32 %v871_v45, %v863_v21 }
  0x43   : > { %v875_v55 = vpop.eup %874  ;;  %v1036_v56 = vmul.f32 %v873_v50, %v949_v63  ;;  %v1039_v57 = vmul.f32 %v873_v50, %v959_v5  ;;  %v1042_v58 = vmul.f32 %v873_v50, %v972_v14  ;;  %v1044_v59 = vmul.f32 %v873_v50, %v865_v25 }
  0x44   : > { %v1047_v60 = vmul.f32 %v875_v55, %v951_v0  ;;  %v1050_v61 = vmul.f32 %v875_v55, %v963_v7  ;;  %v1053_v62 = vmul.f32 %v875_v55, %v975_v16  ;;  %v1055_v1 = vmul.f32 %v875_v55, %v867_v27 }
  0x45   : > { %v400_v63 = vsel %vm395_vm0, %v1014_v46, 0.0  ;;  %v401_v2 = vsel %vm396_vm1, %v1025_v51, 0.0  ;;  %v402_v0 = vsel %vm397_vm2, %v1036_v56, 0.0  ;;  %v436_v3 = vsel %vm431_vm4, %v1017_v47, 0.0 }
  0x46   : > { %v403_v4 = vsel %vm398_vm3, %v1047_v60, 0.0  ;;  %v404_v5 = vadd.f32 %v401_v2, %v400_v63  ;;  %v437_v6 = vsel %vm432_vm5, %v1028_v52, 0.0  ;;  %v438_v7 = vsel %vm433_vm6, %v1039_v57, 0.0 }
  0x47   : > { %v439_v8 = vsel %vm434_vm7, %v1050_v61, 0.0  ;;  %v440_v9 = vadd.f32 %v437_v6, %v436_v3  ;;  %v472_v10 = vsel %vm467_vm8, %v1019_v48, 0.0  ;;  %v473_v11 = vsel %vm468_vm9, %v1031_v53, 0.0 }
  0x48   : > { %v405_v12 = vadd.f32 %v404_v5, %v402_v0  ;;  %v474_v13 = vsel %vm469_vm10, %v1042_v58, 0.0  ;;  %v475_v14 = vsel %vm470_vm11, %v1053_v62, 0.0  ;;  %v476_v15 = vadd.f32 %v473_v11, %v472_v10 }
  0x49   : > { %v441_v16 = vadd.f32 %v440_v9, %v438_v7  ;;  %v508_v17 = vsel %vm503_vm12, %v1021_v49, 0.0  ;;  %v509_v18 = vsel %vm504_vm13, %v1033_v54, 0.0  ;;  %v510_v19 = vsel %vm505_vm14, %v1044_v59, 0.0 }
  0x4a   : > { %v406_v20 = vadd.f32 %v405_v12, %v403_v4  ;;  %v477_v21 = vadd.f32 %v476_v15, %v474_v13  ;;  %v511_v22 = vsel %vm506_vm15, %v1055_v1, 0.0  ;;  %v512_v23 = vadd.f32 %v509_v18, %v508_v17 }
  0x4b   : > { %v442_v24 = vadd.f32 %v441_v16, %v439_v8  ;;  %v416_v25 = vsel %vm395_vm0, 1.0, %v1014_v46  ;;  %v417_v26 = vsel %vm396_vm1, 1.0, %v1025_v51  ;;  %v418_v27 = vsel %vm397_vm2, 1.0, %v1036_v56 }
  0x4c   : > { %v407_v28 = vrot.slane %v406_v20, 4  ;;  %v478_v29 = vadd.f32 %v477_v21, %v475_v14  ;;  %v513_v30 = vadd.f32 %v512_v23, %v510_v19  ;;  %v419_v31 = vsel %vm398_vm3, 1.0, %v1047_v60 }
  0x4d   : > { %v443_v32 = vrot.slane %v442_v24, 4  ;;  %v420_v33 = vadd.f32 %v417_v26, %v416_v25  ;;  %v452_v34 = vsel %vm431_vm4, 1.0, %v1017_v47  ;;  %v453_v35 = vsel %vm432_vm5, 1.0, %v1028_v52 }
  0x4e   : > { %v408_v44 = vadd.f32 %v407_v28, %v406_v20  ;;  %v479_v45 = vrot.slane %v478_v29, 4  ;;  %v514_v50 = vadd.f32 %v513_v30, %v511_v22  ;;  %v454_v55 = vsel %vm433_vm6, 1.0, %v1039_v57  ;;  %v435_v30 = vld [vmem:[#allocation2 + $0x1] sm:$0x1] }
  0x4f   : > { %v444_v63 = vadd.f32 %v443_v32, %v442_v24  ;;  %v421_v2 = vadd.f32 %v420_v33, %v418_v27  ;;  %v455_v0 = vsel %vm434_vm7, 1.0, %v1050_v61  ;;  %v456_v3 = vadd.f32 %v453_v35, %v452_v34  ;;  %v399_v24 = vld [vmem:[#allocation2] sm:$0x1]  ;;  %v471_v35 = vld [vmem:[#allocation2 + $0x2] sm:$0x1] }
  0x50   : > { %v409_v4 = vrot.slane %v408_v44, 2  ;;  %v480_v5 = vadd.f32 %v479_v45, %v478_v29  ;;  %v515_v6 = vrot.slane %v514_v50, 4  ;;  %v488_v7 = vsel %vm467_vm8, 1.0, %v1019_v48 }
  0x51   : > { %vm567_vm0 = vcmp.ge.s32.totalorder %v990_v40, 256  ;;  %v445_v8 = vrot.slane %v444_v63, 2  ;;  %v422_v9 = vadd.f32 %v421_v2, %v419_v31  ;;  %v457_v10 = vadd.f32 %v456_v3, %v454_v55 }
  0x52   : > { %v489_v11 = vsel %vm468_vm9, 1.0, %v1031_v53  ;;  %vm568_vm1 = vcmp.ge.s32.totalorder %v992_v41, 256  ;;  %vm569_vm2 = vcmp.ge.s32.totalorder %v994_v42, 256  ;;  %v410_v12 = vadd.f32 %v409_v4, %v408_v44 }
  0x53   : > { %v481_v13 = vrot.slane %v480_v5, 2  ;;  %v516_v14 = vadd.f32 %v515_v6, %v514_v50  ;;  %v490_v15 = vsel %vm469_vm10, 1.0, %v1042_v58  ;;  %vm570_vm3 = vcmp.ge.s32.totalorder %v999_v43, 256 }
  0x54   : > { %v446_v16 = vadd.f32 %v445_v8, %v444_v63  ;;  %v423_v17 = vrot.slane %v422_v9, 4  ;;  %v458_v18 = vadd.f32 %v457_v10, %v455_v0  ;;  %v491_v19 = vsel %vm470_vm11, 1.0, %v1053_v62 }
  0x55   : > { %v411_v20 = vrot.slane %v410_v12, 1  ;;  %v482_v21 = vadd.f32 %v481_v13, %v480_v5  ;;  %v517_v22 = vrot.slane %v516_v14, 2  ;;  %v492_v23 = vadd.f32 %v489_v11, %v488_v7 }
  0x56   : > { %v447_v25 = vrot.slane %v446_v16, 1  ;;  %v424_v26 = vadd.f32 %v423_v17, %v422_v9  ;;  %v459_v27 = vrot.slane %v458_v18, 4  ;;  %v524_v28 = vsel %vm503_vm12, 1.0, %v1021_v49 }
  0x57   : > { %v412_v29 = vadd.f32 %v411_v20, %v410_v12  ;;  %v483_v31 = vrot.slane %v482_v21, 1  ;;  %v518_v32 = vadd.f32 %v517_v22, %v516_v14  ;;  %v493_v33 = vadd.f32 %v492_v23, %v490_v15  ;;  %v415_v14 = vld [vmem:[#allocation3] sm:$0x1] }
  0x58   : > { %v448_v34 = vadd.f32 %v447_v25, %v446_v16  ;;  %v425_v44 = vrot.slane %v424_v26, 2  ;;  %v460_v45 = vadd.f32 %v459_v27, %v458_v18  ;;  %v525_v50 = vsel %vm504_vm13, 1.0, %v1033_v54 }
  0x59   : > { %v413_v55 = vadd.f32 %v412_v29, %v399_v24  ;;  %v484_v63 = vadd.f32 %v483_v31, %v482_v21  ;;  %v519_v2 = vrot.slane %v518_v32, 1  ;;  %v494_v0 = vadd.f32 %v493_v33, %v491_v19 }
  0x5a   : > { %v449_v3 = vadd.f32 %v448_v34, %v435_v30  ;;  %v426_v4 = vadd.f32 %v425_v44, %v424_v26  ;;  %v461_v5 = vrot.slane %v460_v45, 2  ;;  %v526_v6 = vsel %vm505_vm14, 1.0, %v1044_v59 }
  0x5b   : > { %414 = vst [vmem:[#allocation2] sm:$0x1] %v413_v55  ;;  %v485_v7 = vadd.f32 %v484_v63, %v471_v35  ;;  %v520_v8 = vadd.f32 %v519_v2, %v518_v32  ;;  %v495_v9 = vrot.slane %v494_v0, 4  ;;  %v527_v37 = vsel %vm506_vm15, 1.0, %v1055_v1 }
  0x5c   : > { %450 = vst [vmem:[#allocation2 + $0x1] sm:$0x1] %v449_v3  ;;  %vm639_vm4 = vcmask 1043456   ;;  %v427_v10 = vrot.slane %v426_v4, 1  ;;  %v462_v11 = vadd.f32 %v461_v5, %v460_v45  ;;  %v528_v12 = vadd.f32 %v525_v50, %v524_v28 }
  0x5d   : > { %v572_v13 = vsel %vm567_vm0, %v1014_v46, 0.0  ;;  %486 = vst [vmem:[#allocation2 + $0x2] sm:$0x1] %v485_v7  ;;  %v521_v38 = vadd.f32 %v520_v8, %v507_v36  ;;  %v496_v15 = vadd.f32 %v495_v9, %v494_v0  ;;  %v573_v16 = vsel %vm568_vm1, %v1025_v51, 0.0  ;;  %v451_v46 = vld [vmem:[#allocation3 + $0x1] sm:$0x1] }
  0x5e   : > { %v574_v39 = vsel %vm569_vm2, %v1036_v56, 0.0  ;;  %v428_v17 = vadd.f32 %v427_v10, %v426_v4  ;;  %v463_v18 = vrot.slane %v462_v11, 1  ;;  %v529_v19 = vadd.f32 %v528_v12, %v526_v6 }
  0x5f   : > { %v575_v20 = vsel %vm570_vm3, %v1047_v60, 0.0  ;;  %522 = vst [vmem:[#allocation2 + $0x3] sm:$0x1] %v521_v38  ;;  %v497_v21 = vrot.slane %v496_v15, 2  ;;  %v576_v22 = vadd.f32 %v573_v16, %v572_v13  ;;  %v588_v23 = vsel %vm567_vm0, %v1017_v47, 0.0 }
  0x60   : > { %v589_v51 = vsel %vm568_vm1, %v1028_v52, 0.0  ;;  %v429_v56 = vadd.f32 %v428_v17, %v415_v14  ;;  %v464_v24 = vadd.f32 %v463_v18, %v462_v11  ;;  %v530_v25 = vadd.f32 %v529_v19, %v527_v37 }
  0x61   : > { %v590_v26 = vsel %vm569_vm2, %v1039_v57, 0.0  ;;  %v498_v60 = vadd.f32 %v497_v21, %v496_v15  ;;  %v577_v27 = vadd.f32 %v576_v22, %v574_v39  ;;  %v591_v28 = vsel %vm570_vm3, %v1050_v61, 0.0  ;;  %v487_v61 = vld [vmem:[#allocation3 + $0x2] sm:$0x1] }
  0x62   : > { %v592_v29 = vadd.f32 %v589_v51, %v588_v23  ;;  %430 = vst [vmem:[#allocation3] sm:$0x1] %v429_v56  ;;  %v465_v47 = vadd.f32 %v464_v24, %v451_v46  ;;  %v531_v30 = vrot.slane %v530_v25, 4  ;;  %v604_v52 = vsel %vm567_vm0, %v1019_v48, 0.0 }
  0x63   : > { %v605_v31 = vsel %vm568_vm1, %v1031_v53, 0.0  ;;  %v499_v32 = vrot.slane %v498_v60, 1  ;;  %v578_v57 = vadd.f32 %v577_v27, %v575_v20  ;;  %v606_v34 = vsel %vm569_vm2, %v1042_v58, 0.0 }
  0x64   : > { %v593_v33 = vadd.f32 %v592_v29, %v590_v26  ;;  %466 = vst [vmem:[#allocation3 + $0x1] sm:$0x1] %v465_v47  ;;  %v532_v35 = vadd.f32 %v531_v30, %v530_v25  ;;  %v607_v44 = vsel %vm570_vm3, %v1053_v62, 0.0  ;;  %v608_v45 = vadd.f32 %v605_v31, %v604_v52 }
  0x65   : > { %v620_v48 = vsel %vm567_vm0, %v1021_v49, 0.0  ;;  %v500_v53 = vadd.f32 %v499_v32, %v498_v60  ;;  %v579_v50 = vrot.slane %v578_v57, 4  ;;  %v621_v63 = vsel %vm568_vm1, %v1033_v54, 0.0 }
  0x66   : > { %v594_v55 = vadd.f32 %v593_v33, %v591_v28  ;;  %v638_v58 = vld [vmem:[#allocation2] sm:$0xf]  ;;  %v533_v2 = vrot.slane %v532_v35, 2  ;;  %v609_v0 = vadd.f32 %v608_v45, %v606_v34  ;;  %v622_v3 = vsel %vm569_vm2, %v1044_v59, 0.0  ;;  %v523_v59 = vld [vmem:[#allocation3 + $0x3] sm:$0x1] }
  0x67   : > { %v640_v62 = vsel %vm639_vm4, %v638_v58, 0.0  ;;  %v501_v36 = vadd.f32 %v500_v53, %v487_v61  ;;  %v580_v4 = vadd.f32 %v579_v50, %v578_v57  ;;  %v624_v6 = vadd.f32 %v621_v63, %v620_v48 }
  0x68   : > { %v595_v40 = vrot.slane %v594_v55, 4  ;;  %641 = vadd.xlane.f32.xlu0 %v640_v62  ;;  %v534_v49 = vadd.f32 %v533_v2, %v532_v35  ;;  %v610_v5 = vadd.f32 %v609_v0, %v607_v44  ;;  %v623_v54 = vsel %vm570_vm3, %v1055_v1, 0.0 }
  0x69   : > { %502 = vst [vmem:[#allocation3 + $0x2] sm:$0x1] %v501_v36  ;;  %v581_v7 = vrot.slane %v580_v4, 2  ;;  %v625_v42 = vadd.f32 %v624_v6, %v622_v3  ;;  %v571_v16 = vld [vmem:[#allocation3] sm:$0x1]  ;;  %vm643_vm5 = vcmask 3072  }
  0x6a   : > { %v596_v41 = vadd.f32 %v595_v40, %v594_v55  ;;  %v535_v8 = vrot.slane %v534_v49, 1  ;;  %v611_v9 = vrot.slane %v610_v5, 4 }
  0x6b   : > { %v582_v37 = vadd.f32 %v581_v7, %v580_v4  ;;  %v626_v13 = vadd.f32 %v625_v42, %v623_v54  ;;  %v587_v43 = vld [vmem:[#allocation3 + $0x1] sm:$0x1] }
  0x6c   : > { %v597_v10 = vrot.slane %v596_v41, 2  ;;  %v536_v11 = vadd.f32 %v535_v8, %v534_v49  ;;  %v612_v12 = vadd.f32 %v611_v9, %v610_v5 }
  0x6d   : > { %v583_v38 = vrot.slane %v582_v37, 1  ;;  %v627_v17 = vrot.slane %v626_v13, 4 }
  0x6e   : > { %v598_v14 = vadd.f32 %v597_v10, %v596_v41  ;;  %v537_v15 = vadd.f32 %v536_v11, %v523_v59  ;;  %v613_v39 = vrot.slane %v612_v12, 2 }
  0x6f   : > { %v584_v18 = vadd.f32 %v583_v38, %v582_v37  ;;  %v628_v20 = vadd.f32 %v627_v17, %v626_v13 }
  0x70   : > { %v599_v19 = vrot.slane %v598_v14, 1  ;;  %538 = vst [vmem:[#allocation3 + $0x3] sm:$0x1] %v537_v15  ;;  %v614_v1 = vadd.f32 %v613_v39, %v612_v12  ;;  %v603_v56 = vld [vmem:[#allocation3 + $0x2] sm:$0x1] }
  0x71   : > { %v585_v46 = vsub.f32 %v571_v16, %v584_v18  ;;  %v629_v23 = vrot.slane %v628_v20, 2 }
  0x72   : > { %v600_v21 = vadd.f32 %v599_v19, %v598_v14  ;;  %v615_v22 = vrot.slane %v614_v1, 1 }
  0x73   : > { %586 = vst [vmem:[#allocation3] sm:$0x1] %v585_v46  ;;  %v630_v25 = vadd.f32 %v629_v23, %v628_v20 }
  0x74   : > { %v601_v51 = vsub.f32 %v587_v43, %v600_v21  ;;  %v616_v24 = vadd.f32 %v615_v22, %v614_v1 }
  0x75   : > { %v631_v60 = vrot.slane %v630_v25, 1 }
  0x76   : > { %602 = vst [vmem:[#allocation3 + $0x1] sm:$0x1] %v601_v51  ;;  %v617_v26 = vsub.f32 %v603_v56, %v616_v24 }
  0x77   : > { %v619_v27 = vld [vmem:[#allocation3 + $0x3] sm:$0x1]  ;;  %v632_v28 = vadd.f32 %v631_v60, %v630_v25 }
  0x78   : > { %618 = vst [vmem:[#allocation3 + $0x2] sm:$0x1] %v617_v26 }
  0x79   : > { %v633_v29 = vsub.f32 %v619_v27, %v632_v28 }
  0x7b   : > { %634 = vst [vmem:[#allocation3 + $0x3] sm:$0x1] %v633_v29 }
  0x82   : > { %v645_v47 = vld [vmem:[#allocation3] sm:$0xf] }
  0x83   : > { %v646_v30 = vsel %vm639_vm4, %v645_v47, 0.0 }
  0x84   : > { %647 = vadd.xlane.f32.xlu0 %v646_v30 }
  0xf5   : > { %v642_v52 = vpop.xlane.xlu0 %641 }
  0xf6   : > { %644 = vst.msk [vmem:[%s265_s27] sm:$0xf] %vm643_vm5, %v642_v52 }
 0x111   : > { %v648_v31 = vpop.xlane.xlu0 %647 }
 0x112   : > { %649 = vst.msk [vmem:[%s272_s30] sm:$0xf] %vm643_vm5, %v648_v31 }
 0x113 PF: > { %s14_s14 = sadd.s32 1, %s898_s14   ;;  %s1227_s12 = smov %s894_s13 }
 0x114   : > { %p11_p5 = scmp.ge.s32.totalorder %s14_s14, 4   ;;  %s1228_s13 = smov %s1230_s15 }
 0x116   :  { %13 = sbr.rel (!%p11_p5) target bundleno = 2 (0x2), region = 88 }

</bundles_post_ra>
